<compile_context>
chip_gen: v5e
topology: v5e:2x2
jax: 0.10.0
libtpu: 0.0.40
codegen_flags: <defaults>
</compile_context>

<pallas_src>
import functools

import jax
import jax.numpy as jnp
from jax.experimental import pallas as pl
from jax.experimental.pallas import tpu as pltpu


def _round_up(x, m):
    return ((x + m - 1) // m) * m


def _se_kernel(hw, inv_hw, needs_mask,
               x_ref, w1_ref, b1_ref, w2_ref, b2_ref, out_ref, acc_ref):
    # x_ref:  (1, C, hw_tile)     -- HW lane-dense, native (unpadded) C
    # w1_ref: (C, Chp)   b1_ref: (1, Chp)
    # w2_ref: (Chp, Cg)  b2_ref: (1, Cg)
    # out_ref:(1, 1, Cg)          -- lane-dense gate for this batch row
    # acc_ref:(1, C, hw_tile) f32 -- running lane-partial spatial sum
    k = pl.program_id(1)

    @pl.when(k == 0)
    def _init():
        acc_ref[...] = jnp.zeros_like(acc_ref)

    xt = x_ref[...]
    if xt.dtype != jnp.float32:          # bf16 stream -> f32 accumulate
        xt = xt.astype(jnp.float32)
    if needs_mask:                        # only traced when HW % hw_tile != 0
        hw_tile = xt.shape[-1]
        lane = jax.lax.broadcasted_iota(jnp.int32, xt.shape, dimension=2)
        xt = jnp.where(k * hw_tile + lane < hw, xt, 0.0)

    # Pure VPU add; no per-step cross-lane/sublane reduction.
    acc_ref[...] += xt

    @pl.when(k == pl.num_programs(1) - 1)
    def _finalize():
        # One cross-lane reduce for the spatial mean, then the tiny MLP.
        pooled = jnp.sum(acc_ref[...], axis=2) * inv_hw                # (1, C)
        h = jnp.dot(pooled, w1_ref[...], preferred_element_type=jnp.float32)
        h = jnp.maximum(h + b1_ref[...], 0.0)                          # (1, Chp)
        g = jnp.dot(h, w2_ref[...], preferred_element_type=jnp.float32)
        g = jax.nn.sigmoid(g + b2_ref[...])                            # (1, Cg)
        out_ref[...] = g.reshape(out_ref.shape).astype(out_ref.dtype)


def se_forward(x, w1, b1, w2, b2, *, hw_tile=None):
    """x: (B, C, H, W).  w1: (C, Ch), b1: (Ch,), w2: (Ch, C), b2: (C,).

    Returns the (B, C, 1, 1) sigmoid gate, like SE.forward.
    """
    B, C, H, W = x.shape
    HW = H * W
    Ch = w1.shape[1]

    Chp = _round_up(Ch, 128)   # lane-pad hidden dim (weights only; tiny)
    Cg = _round_up(C, 128)     # lane-pad gate output dim (weights/out only)

    try:
        vmem_cap = int(pltpu.get_tpu_info().vmem_capacity_bytes)
    except Exception:
        vmem_cap = 64 << 20    # conservative (v7x-sized) fallback

    itemsize = jnp.dtype(x.dtype).itemsize

    # HW tile (lane axis, multiple of 128): per-buffer budget scales with the
    # chip's VMEM (~8 MiB on 64 MiB v7x, ~16 MiB on 128 MiB v5e/v6e) so the
    # double-buffered x stream stays pipelined without risking VMEM pressure.
    if hw_tile is None:
        per_buf_budget = min(max(vmem_cap // 8, 4 << 20), 16 << 20)
        cols = max(128, per_buf_budget // max(1, C * itemsize))
        hw_tile = (cols // 128) * 128
    hw_tile = max(128, (hw_tile // 128) * 128)
    hw_tile = min(hw_tile, _round_up(HW, 128))

    num_hw_tiles = pl.cdiv(HW, hw_tile)
    needs_mask = (HW % hw_tile) != 0   # remainder tile masked in-kernel

    # Free layout change: NCHW -> (B, C, HW) is a pure reshape (no copy,
    # no transpose, no padding of the big tensor in HBM).
    x3 = x.reshape(B, C, HW)

    # Tiny MLP params, zero-padded on output dims only (inert through the MLP).
    w1p = jnp.zeros((C, Chp), jnp.float32).at[:, :Ch].set(w1.astype(jnp.float32))
    b1p = jnp.zeros((1, Chp), jnp.float32).at[0, :Ch].set(b1.astype(jnp.float32))
    w2p = jnp.zeros((Chp, Cg), jnp.float32).at[:Ch, :C].set(w2.astype(jnp.float32))
    b2p = jnp.zeros((1, Cg), jnp.float32).at[0, :C].set(b2.astype(jnp.float32))

    tile_bytes = C * hw_tile * itemsize
    acc_bytes = C * hw_tile * 4
    weight_bytes = (C * Chp + Chp + Chp * Cg + Cg) * 4
    out_bytes = Cg * 4
    vmem_limit = 2 * tile_bytes + acc_bytes + 2 * weight_bytes + 2 * out_bytes + (4 << 20)
    vmem_limit = int(min(max(vmem_limit, 16 << 20), (vmem_cap * 3) // 5))

    cost = pl.CostEstimate(
        flops=B * C * HW + 2 * B * C * Chp + 2 * B * Chp * Cg,
        transcendentals=B * Cg,
        bytes_accessed=B * C * HW * itemsize + weight_bytes + B * out_bytes,
    )

    gate_padded = pl.pallas_call(
        functools.partial(_se_kernel, HW, 1.0 / float(HW), needs_mask),
        out_shape=jax.ShapeDtypeStruct((B, 1, Cg), jnp.float32),
        grid_spec=pltpu.PrefetchScalarGridSpec(
            num_scalar_prefetch=0,
            grid=(B, num_hw_tiles),
            in_specs=[
                pl.BlockSpec((1, C, hw_tile), lambda b, k: (b, 0, k)),  # x tile
                pl.BlockSpec((C, Chp), lambda b, k: (0, 0)),            # w1
                pl.BlockSpec((1, Chp), lambda b, k: (0, 0)),            # b1
                pl.BlockSpec((Chp, Cg), lambda b, k: (0, 0)),           # w2
                pl.BlockSpec((1, Cg), lambda b, k: (0, 0)),             # b2
            ],
            out_specs=pl.BlockSpec((1, 1, Cg), lambda b, k: (b, 0, 0)),
            scratch_shapes=[pltpu.VMEM((1, C, hw_tile), jnp.float32)],
        ),
        compiler_params=pltpu.CompilerParams(
            # batch axis parallel (both v7x TCs stream HBM); HW axis is the
            # sequential reduction.
            dimension_semantics=("parallel", "arbitrary"),
            vmem_limit_bytes=vmem_limit,
        ),
        cost_estimate=cost,
    )(x3, w1p, b1p, w2p, b2p)

    return gate_padded[:, 0, :C].reshape(B, C, 1, 1)


if __name__ == "__main__":
    # Small shapes consistent with the module: planes=32, r=16 -> hidden=2.
    B, C, H, W = 2, 32, 16, 16
    r = 16
    Ch = C // r

    key = jax.random.PRNGKey(0)
    kx, kw1, kb1, kw2, kb2 = jax.random.split(key, 5)

    x = jax.random.normal(kx, (B, C, H, W), dtype=jnp.float32)
    # nn.Linear stores weight as (out, in); we keep (in, out) so the kernel
    # computes pooled @ W directly (equivalent to PyTorch's x @ W.T).
    w1 = jax.random.normal(kw1, (C, Ch), dtype=jnp.float32) * 0.1
    b1 = jax.random.normal(kb1, (Ch,), dtype=jnp.float32) * 0.1
    w2 = jax.random.normal(kw2, (Ch, C), dtype=jnp.float32) * 0.1
    b2 = jax.random.normal(kb2, (C,), dtype=jnp.float32) * 0.1

    out = se_forward(x, w1, b1, w2, b2)
    jax.block_until_ready(out)

    # Reference check in plain JAX (same math as the PyTorch module).
    pooled = jnp.mean(x, axis=(2, 3))
    h_ref = jnp.maximum(pooled @ w1 + b1, 0.0)
    ref = jax.nn.sigmoid(h_ref @ w2 + b2).reshape(B, C, 1, 1)
    assert out.shape == (B, C, 1, 1)
    assert jnp.allclose(out, ref, atol=1e-5), "mismatch vs reference"

    print("KERNEL_OK")
</pallas_src>

<mosaic_0001>
module attributes {stable_mosaic.version = 11 : i64} {
  func.func @_se_kernel(%arg0: i32, %arg1: i32, %arg2: memref<1x32x256xf32, #tpu.memory_space<vmem>>, %arg3: memref<32x128xf32, #tpu.memory_space<vmem>>, %arg4: memref<1x128xf32, #tpu.memory_space<vmem>>, %arg5: memref<128x128xf32, #tpu.memory_space<vmem>>, %arg6: memref<1x128xf32, #tpu.memory_space<vmem>>, %arg7: memref<1x1x128xf32, #tpu.memory_space<vmem>>, %arg8: memref<1x32x256xf32, #tpu.memory_space<vmem>>) attributes {dimension_semantics = [#tpu.dimension_semantics<parallel>, #tpu.dimension_semantics<arbitrary>], iteration_bounds = array<i64: 2, 1>, scalar_prefetch = 0 : i64, scratch_operands = 1 : i64, tpu.core_type = #tpu.core_type<tc>, window_params = [{transform_indices = @transform_0, window_bounds = array<i64: 1, 32, 256>}, {pipeline_mode = #tpu.pipeline_mode<synchronous>, transform_indices = @transform_1, window_bounds = array<i64: 32, 128>}, {pipeline_mode = #tpu.pipeline_mode<synchronous>, transform_indices = @transform_2, window_bounds = array<i64: 1, 128>}, {pipeline_mode = #tpu.pipeline_mode<synchronous>, transform_indices = @transform_3, window_bounds = array<i64: 128, 128>}, {pipeline_mode = #tpu.pipeline_mode<synchronous>, transform_indices = @transform_4, window_bounds = array<i64: 1, 128>}, {transform_indices = @transform_5, window_bounds = array<i64: 1, 1, 128>}]} {
    %c0_i32 = arith.constant 0 : i32
    %0 = arith.cmpi eq, %arg1, %c0_i32 : i32
    %1 = arith.extui %0 : i1 to i32
    %c0_i32_0 = arith.constant 0 : i32
    %2 = arith.cmpi ne, %1, %c0_i32_0 : i32
    scf.if %2 {
      %cst = arith.constant 0.000000e+00 : f32
      %10 = vector.broadcast %cst : f32 to vector<1x32x256xf32>
      %c0_11 = arith.constant 0 : index
      %c0_12 = arith.constant 0 : index
      %c0_13 = arith.constant 0 : index
      %11 = vector.load %arg8[%c0_11, %c0_12, %c0_13] : memref<1x32x256xf32, #tpu.memory_space<vmem>>, vector<1x32x256xf32>
      tpu.vector_store %arg8[%c0_11, %c0_12, %c0_13], %10 {strides = array<i32>} : memref<1x32x256xf32, #tpu.memory_space<vmem>>, vector<1x32x256xf32>,
    } else {
    }
    %c0 = arith.constant 0 : index
    %c0_1 = arith.constant 0 : index
    %c0_2 = arith.constant 0 : index
    %3 = vector.load %arg2[%c0, %c0_1, %c0_2] : memref<1x32x256xf32, #tpu.memory_space<vmem>>, vector<1x32x256xf32>
    %c0_3 = arith.constant 0 : index
    %c0_4 = arith.constant 0 : index
    %c0_5 = arith.constant 0 : index
    %4 = vector.load %arg8[%c0_3, %c0_4, %c0_5] : memref<1x32x256xf32, #tpu.memory_space<vmem>>, vector<1x32x256xf32>
    %5 = arith.addf %4, %3 : vector<1x32x256xf32>
    %c0_6 = arith.constant 0 : index
    %c0_7 = arith.constant 0 : index
    %c0_8 = arith.constant 0 : index
    %6 = vector.load %arg8[%c0_6, %c0_7, %c0_8] : memref<1x32x256xf32, #tpu.memory_space<vmem>>, vector<1x32x256xf32>
    tpu.vector_store %arg8[%c0_6, %c0_7, %c0_8], %5 {strides = array<i32>} : memref<1x32x256xf32, #tpu.memory_space<vmem>>, vector<1x32x256xf32>,
    %c0_i32_9 = arith.constant 0 : i32
    %7 = arith.cmpi eq, %arg1, %c0_i32_9 : i32
    %8 = arith.extui %7 : i1 to i32
    %c0_i32_10 = arith.constant 0 : i32
    %9 = arith.cmpi ne, %8, %c0_i32_10 : i32
    scf.if %9 {
      %c0_11 = arith.constant 0 : index
      %c0_12 = arith.constant 0 : index
      %c0_13 = arith.constant 0 : index
      %10 = vector.load %arg8[%c0_11, %c0_12, %c0_13] : memref<1x32x256xf32, #tpu.memory_space<vmem>>, vector<1x32x256xf32>
      %cst = arith.constant dense<0.000000e+00> : vector<1x32xf32>
      %11 = vector.multi_reduction <add>, %10, %cst [2] : vector<1x32x256xf32> to vector<1x32xf32>
      %cst_14 = arith.constant 3.906250e-03 : f32
      %12 = vector.broadcast %cst_14 : f32 to vector<1x32xf32>
      %13 = arith.mulf %11, %12 : vector<1x32xf32>
      %c0_15 = arith.constant 0 : index
      %c0_16 = arith.constant 0 : index
      %14 = vector.load %arg3[%c0_15, %c0_16] : memref<32x128xf32, #tpu.memory_space<vmem>>, vector<32x128xf32>
      %cst_17 = arith.constant dense<0.000000e+00> : vector<1x128xf32>
      %15 = tpu.matmul %13, %14, %cst_17 {dimension_numbers = #tpu.dot_dimension_numbers<[1], [0], [0], [1], [0, 0, 1, 1], [], []>} : vector<1x32xf32>, vector<32x128xf32>, vector<1x128xf32> -> vector<1x128xf32>
      %c0_18 = arith.constant 0 : index
      %c0_19 = arith.constant 0 : index
      %16 = vector.load %arg4[%c0_18, %c0_19] : memref<1x128xf32, #tpu.memory_space<vmem>>, vector<1x128xf32>
      %17 = arith.addf %15, %16 : vector<1x128xf32>
      %cst_20 = arith.constant 0.000000e+00 : f32
      %18 = vector.broadcast %cst_20 : f32 to vector<1x128xf32>
      %19 = arith.maximumf %17, %18 : vector<1x128xf32>
      %c0_21 = arith.constant 0 : index
      %c0_22 = arith.constant 0 : index
      %20 = vector.load %arg5[%c0_21, %c0_22] : memref<128x128xf32, #tpu.memory_space<vmem>>, vector<128x128xf32>
      %cst_23 = arith.constant dense<0.000000e+00> : vector<1x128xf32>
      %21 = tpu.matmul %19, %20, %cst_23 {dimension_numbers = #tpu.dot_dimension_numbers<[1], [0], [0], [1], [0, 0, 1, 1], [], []>} : vector<1x128xf32>, vector<128x128xf32>, vector<1x128xf32> -> vector<1x128xf32>
      %c0_24 = arith.constant 0 : index
      %c0_25 = arith.constant 0 : index
      %22 = vector.load %arg6[%c0_24, %c0_25] : memref<1x128xf32, #tpu.memory_space<vmem>>, vector<1x128xf32>
      %23 = arith.addf %21, %22 : vector<1x128xf32>
      %24 = arith.negf %23 : vector<1x128xf32>
      %25 = math.exp %24 : vector<1x128xf32>
      %cst_26 = arith.constant 1.000000e+00 : f32
      %26 = vector.broadcast %cst_26 : f32 to vector<1x128xf32>
      %27 = arith.addf %26, %25 : vector<1x128xf32>
      %28 = arith.divf %26, %27 : vector<1x128xf32>
      %29 = vector.shape_cast %28 : vector<1x128xf32> to vector<1x1x128xf32>
      %c0_27 = arith.constant 0 : index
      %c0_28 = arith.constant 0 : index
      %c0_29 = arith.constant 0 : index
      %30 = vector.load %arg7[%c0_27, %c0_28, %c0_29] : memref<1x1x128xf32, #tpu.memory_space<vmem>>, vector<1x1x128xf32>
      tpu.vector_store %arg7[%c0_27, %c0_28, %c0_29], %29 {strides = array<i32>} : memref<1x1x128xf32, #tpu.memory_space<vmem>>, vector<1x1x128xf32>,
    } else {
    }
    return
  }
  func.func @transform_0(%arg0: i32, %arg1: i32) -> (i32, i32, i32) {
    %c0_i32 = arith.constant 0 : i32
    %c0_i32_0 = arith.constant 0 : i32
    return %arg0, %c0_i32, %arg1 : i32, i32, i32
  }
  func.func @transform_1(%arg0: i32, %arg1: i32) -> (i32, i32) {
    %c0_i32 = arith.constant 0 : i32
    %c0_i32_0 = arith.constant 0 : i32
    %c0_i32_1 = arith.constant 0 : i32
    return %c0_i32, %c0_i32_0 : i32, i32
  }
  func.func @transform_2(%arg0: i32, %arg1: i32) -> (i32, i32) {
    %c0_i32 = arith.constant 0 : i32
    %c0_i32_0 = arith.constant 0 : i32
    %c0_i32_1 = arith.constant 0 : i32
    return %c0_i32, %c0_i32_0 : i32, i32
  }
  func.func @transform_3(%arg0: i32, %arg1: i32) -> (i32, i32) {
    %c0_i32 = arith.constant 0 : i32
    %c0_i32_0 = arith.constant 0 : i32
    %c0_i32_1 = arith.constant 0 : i32
    return %c0_i32, %c0_i32_0 : i32, i32
  }
  func.func @transform_4(%arg0: i32, %arg1: i32) -> (i32, i32) {
    %c0_i32 = arith.constant 0 : i32
    %c0_i32_0 = arith.constant 0 : i32
    %c0_i32_1 = arith.constant 0 : i32
    return %c0_i32, %c0_i32_0 : i32, i32
  }
  func.func @transform_5(%arg0: i32, %arg1: i32) -> (i32, i32, i32) {
    %c0_i32 = arith.constant 0 : i32
    %c0_i32_0 = arith.constant 0 : i32
    %c0_i32_1 = arith.constant 0 : i32
    return %arg0, %c0_i32, %c0_i32_0 : i32, i32, i32
  }
}

</mosaic_0001>

<bundles_post_ra>
// kernel: tpu_custom_call.1
= control target key start
LH: loop header
LB: loop body
LE: loop exit
PB: predicated region body
PF: predicated region fallthrough
CT: control target
= control target key end

     0   :  { %s1063_s0 = inlined_call_operand.hbm [shape: f32[2,32,256], index: 0, kind: input, shape index: {}]   ;;  %s1064_s1 = inlined_call_operand.hbm [shape: f32[32,128], index: 1, kind: input, shape index: {}]   ;;  %s1065_s2 = inlined_call_operand.vmem [shape: f32[1,128], index: 2, kind: input, shape index: {}]   ;;  %s1066_s3 = inlined_call_operand.hbm [shape: f32[128,128], index: 3, kind: input, shape index: {}]   ;;  %s1067_s4 = inlined_call_operand.vmem [shape: f32[1,128], index: 4, kind: input, shape index: {}]   ;;  %s1068_s5 = inlined_call_operand.hbm [shape: f32[2,1,128], index: 5, kind: output, shape index: {}]  }
   0x1   :  { %1070 = sst [smem:[#allocation14_spill]] %s1064_s1 }
   0x2   :  { %1071 = sst [smem:[#allocation15_spill]] %s1066_s3 }
   0x3   :  { %10 = vsyncpa [#allocation4], 0 }
   0x4   :  { %12 = vsyncpa [#allocation4 + $0x1], 0 }
   0x5   :  { %13 = vsyncpa [#allocation7], 0 }
   0x6   :  { %14 = vsyncpa [#allocation5], 0 }
   0x7   :  { %16 = vsyncpa [#allocation5 + $0x1], 0  ;;  %s902_s18 = smov 0   ;;  %s904_s19 = smov 0  }
   0x8   :  { %s906_s20 = smov 0   ;;  %s908_s21 = smov 0  }
   0x9   :  { %s910_s22 = smov 0   ;;  %s912_s23 = smov 0  }
   0xa LB: > { %s579_s24 = sadd.s32 4294967295, %s864_s23   ;;  %s580_s25 = sadd.s32 4294967294, %s864_s23   ;;  %s864_s23 = sphi %s912_s23, %s22_s23   ;;  %s860_s22 = sphi %s910_s22, %s1087_s22   ;;  %s856_s21 = sphi %s908_s21, %s1086_s21   ;;  %s852_s20 = sphi %s906_s20, %s1085_s20   ;;  %s848_s19 = sphi %s904_s19, %s1084_s19   ;;  %s844_s18 = sphi %s902_s18, %s1083_s18  }
   0xb   : > { %p56_p0 = scmp.ne.s32.totalorder %s848_s19, %s844_s18  ;;  %p936_p1 = scmp.eq.s32.totalorder %s579_s24, 0 }
   0xc   : > { %p940_p2 = scmp.eq.s32.totalorder %s579_s24, 1  ;;  %p170_p3 = scmp.eq.s32.totalorder %s580_s25, 1 }
   0xd   : > { %p946_p4 = por %p936_p1, %p56_p0  ;;  %p581_p5 = scmp.ge.s32.totalorder %s864_s23, 1 }
   0xe   : > { %p951_p6 = por %p170_p3, %p56_p0  ;;  %p177_p7 = scmp.lt.s32.totalorder %s864_s23, 3 }
   0xf   : > { %s1076_s1 = sld [smem:[#allocation14_spill]]  ;;  %s866_s9 = smov [#allocation6]  }
  0x10   : > { %p959_p8 = pnand %p581_p5, %p177_p7  ;;  %s190_s10 = sshll.u32 %s866_s9, 4  ;;  %s191_s10 = int_to_ptr.vmem [resolvable:$true] %s190_s10 }
  0x11   : > { %p584_p11 = scmp.ge.s32.totalorder %s864_s23, 2  ;;  %s1078_s3 = sld [smem:[#allocation15_spill]] }
  0x12   : > { %p609_p9 = pneg %p959_p8  ;;  %s867_s14 = smov 128  }
  0x13   : > { %s868_s15 = smov 8   ;;  %s869_s16 = smov [#allocation8]  }
  0x14   : > { %p610_p10 = pnand %p609_p9, %p936_p1  ;;  %s207_s17 = sshll.u32 %s869_s16, 4  ;;  %s208_s17 = int_to_ptr.vmem [resolvable:$true] %s207_s17 }
  0x15   : > { %s188_s7 = sshll.u32 %s1076_s1, 4  ;;  %s34_s24 = sadd.s32 1, %s860_s22  ;;  %s189_s7 = int_to_ptr.hbm [resolvable:$true] %s188_s7 }
  0x16   : > { %612 = dma.hbm_to_vmem [thread:$0]  (!%p610_p10), %s189_s7, 512, %s191_s10, [#allocation7], %s867_s14, %s867_s14, %s868_s15  }
  0x17   : > { %s205_s13 = sshll.u32 %s1078_s3, 4  ;;  %s43_s25 = sadd.s32 1, %s852_s20  ;;  %s206_s13 = int_to_ptr.hbm [resolvable:$true] %s205_s13 }
  0x18   : > { %615 = dma.hbm_to_vmem [thread:$0]  (!%p610_p10), %s206_s13, 2048, %s208_s17, [#allocation7], %s867_s14, %s867_s14, %s868_s15  }
  0x19   : > { %p36_p12 = scmp.ge.s32.totalorder %s34_s24, 2  ;;  %p50_p13 = scmp.ne.s32.totalorder %s852_s20, %s848_s19 }
  0x1a   : > { %p51_p0 = scmp.eq.s32.totalorder %s864_s23, 0  ;;  %p626_p3 = scmp.lt.s32.totalorder %s864_s23, 2 }
  0x1b   : > { %s1089_s24 = smov (%p36_p12, %s34_s24), 0  ;;  %p985_p7 = por %p940_p2, %p50_p13 }
  0x1c   : > { %1079 = sst [smem:[#allocation13_spill]] %s1089_s24  ;;  %p979_p5 = por %p51_p0, %p50_p13 }
  0x1d   : > { %s38_s7 = ssub.s32 %s860_s22, %s1089_s24  ;;  %s224_s9 = sand.u32 1, %s852_s20  }
  0x1e   : > { %p41_p9 = scmp.eq.s32.totalorder %s38_s7, 0  ;;  %s585_s10 = sshll.u32 %s224_s9, 6 }
  0x1f   : > { %s596_s11 = sshll.u32 %s860_s22, 6  ;;  %s228_s17 = scalar_lea.vmem [#allocation3], %s585_s10 }
  0x20   : > { %s994_s12 = scalar_select %p41_p9, %s852_s20, %s43_s25  }
  0x21   : > { %s235_s15 = scalar_lea.hbm %s1063_s0, %s596_s11  ;;  %s238_s1 = sshll.u32 %s228_s17, 4  ;;  %s239_s1 = int_to_ptr.vmem [resolvable:$true] %s238_s1 }
  0x22   : > { %s236_s16 = sshll.u32 %s235_s15, 4  ;;  %p617_p2 = pnand %p626_p3, %p979_p5  ;;  %s237_s16 = int_to_ptr.hbm [resolvable:$true] %s236_s16 }
  0x23   : > { %s225_s27 = scalar_lea.sflag [#allocation4], %s224_s9  ;;  %s870_s3 = smov 256  }
  0x24   : > { %s871_s24 = smov 16   ;;  %250 = sbr.rel (%p959_p8) target bundleno = 467 (0x1d3), region = 40 }
  0x25   : > { %619 = dma.hbm_to_vmem [thread:$0]  (!%p617_p2), %s237_s16, 1024, %s239_s1, %s225_s27, %s870_s3, %s870_s3, %s871_s24  }
  0x26   : > { %s1006_s25 = sand.u32 (!%p959_p8), 1, %s848_s19  }
  0x27   : > { %s589_s7 = sshll.u32 (!%p959_p8), %s1006_s25, 6  ;;  %s253_s10 = scalar_lea.sflag (!%p959_p8), [#allocation4], %s1006_s25 }
  0x28   : > { %s256_s11 = scalar_lea.vmem (!%p959_p8), [#allocation3], %s589_s7 }
  0x29   : > { %831 = dma.done.wait (%p946_p4), %s253_s10, 1024  }
  0x2a   : > { %833 = vsyncadd (%p946_p4), %s253_s10, 4294966272 }
  0x2b   : > { %835 = dma.done.wait (%p936_p1), [#allocation7], 2560  }
  0x2c   : > { %837 = vsyncadd (%p936_p1), [#allocation7], 4294964736  ;;  %v306_v0 = vld [vmem:[%s256_s11] sm:$0xff]  ;;  %v307_v1 = vld [vmem:[%s256_s11 + $0x8] sm:$0xff]  ;;  %v374_v25 = vlaneseq  ;;  %vm379_vm0 = vcmask 130112   ;;  %vm383_vm1 = vcmask 195712   ;;  %s479_s30 = scalar_lea.hbm %s1068_s5, %s856_s21 }
  0x2d   : > { %v310_v2 = vld [vmem:[%s256_s11 + $0x20] sm:$0xff]  ;;  %v349_v3 = vadd.f32 %v307_v1, %v306_v0  ;;  %v311_v4 = vld [vmem:[%s256_s11 + $0x28] sm:$0xff]  ;;  %v308_v6 = vld [vmem:[%s256_s11 + $0x10] sm:$0xff]  ;;  %vm387_vm2 = vcmask 261312   ;;  %vm389_vm3 = vcmask 261120   ;;  %s292_s9 = scalar_lea.vmem [#allocation9], %s1006_s25 }
  0x2e   : > { %v355_v5 = vadd.f32 %v311_v4, %v310_v2  ;;  %v309_v7 = vld [vmem:[%s256_s11 + $0x18] sm:$0xff]  ;;  %v312_v8 = vld [vmem:[%s256_s11 + $0x30] sm:$0xff]  ;;  %v366_v14 = vld [vmem:[#allocation6 + $0x8] sm:$0xff]  ;;  %v375_v30 = vand.u32 127, %v374_v25  ;;  %s481_s13 = sshll.u32 %s292_s9, 4  ;;  %s483_s14 = sshll.u32 %s479_s30, 4  ;;  %s482_s13 = int_to_ptr.vmem [resolvable:$true] %s481_s13  ;;  %s484_s14 = int_to_ptr.hbm [resolvable:$true] %s483_s14 }
  0x2f   : > { %350 = vadd.xlane.f32.xlu0 %v349_v3  ;;  %v313_v9 = vld [vmem:[%s256_s11 + $0x38] sm:$0xff]  ;;  %v352_v10 = vadd.f32 %v309_v7, %v308_v6  ;;  %v367_v13 = vld [vmem:[#allocation6 + $0x10] sm:$0xff]  ;;  %v365_v15 = vld [vmem:[#allocation6] sm:$0xff]  ;;  %s471_s21 = scalar_lea.sflag [#allocation5], %s1006_s25  ;;  %s792_s15 = sshra.s32 %s484_s14, 4  ;;  %s793_s15 = int_to_ptr.hbm [resolvable:$true] %s792_s15 }
  0x30   : > { %356 = vadd.xlane.f32.xlu1 %v355_v5  ;;  %v358_v11 = vadd.f32 %v313_v9, %v312_v8  ;;  %v368_v12 = vld [vmem:[#allocation6 + $0x18] sm:$0xff]  ;;  %v427_v17 = vld [vmem:[#allocation8 + $0x70] sm:$0xff]  ;;  %v426_v18 = vld [vmem:[#allocation8 + $0x68] sm:$0xff]  ;;  %v377_v34 = vadd.s32 4294967288, %v375_v30  ;;  %v381_v35 = vadd.s32 4294967280, %v375_v30  ;;  %v385_v38 = vadd.s32 4294967272, %v375_v30  ;;  %p799_p10 = scmp.lt.s32.totalorder %s793_s15, %s1068_s5 }
  0x31   : > { %404 = vmatpush.msra.mxu0 %v368_v12  ;;  %v428_v16 = vld [vmem:[#allocation8 + $0x78] sm:$0xff]  ;;  %v425_v19 = vld [vmem:[#allocation8 + $0x60] sm:$0xff]  ;;  %v423_v21 = vld [vmem:[#allocation8 + $0x50] sm:$0xff]  ;;  %s794_s16 = scalar_lea.hbm %s793_s15, 1  ;;  %s798_s7 = scalar_lea.hbm %s1068_s5, 2 }
  0x32   : > { %430 = vmatpush.msra.mxu1 %v428_v16  ;;  %v424_v20 = vld [vmem:[#allocation8 + $0x58] sm:$0xff]  ;;  %v422_v22 = vld [vmem:[#allocation8 + $0x48] sm:$0xff]  ;;  %v421_v23 = vld [vmem:[#allocation8 + $0x40] sm:$0xff]  ;;  %p795_p1 = scmp.ne.s32.totalorder %s793_s15, %s794_s16  ;;  %p800_p12 = scmp.lt.s32.totalorder %s798_s7, %s794_s16 }
  0x33   : > { %405 = vmatpush.msra.mxu0 %v367_v13  ;;  %v420_v24 = vld [vmem:[#allocation8 + $0x38] sm:$0xff]  ;;  %v419_v27 = vld [vmem:[#allocation8 + $0x30] sm:$0xff]  ;;  %v418_v29 = vld [vmem:[#allocation8 + $0x28] sm:$0xff] }
  0x34   : > { %431 = vmatpush.msra.mxu1 %v427_v17  ;;  %v417_v31 = vld [vmem:[#allocation8 + $0x20] sm:$0xff]  ;;  %v416_v32 = vld [vmem:[#allocation8 + $0x18] sm:$0xff]  ;;  %v415_v49 = vld [vmem:[#allocation8 + $0x10] sm:$0xff]  ;;  %p796_p4 = pnand %p795_p1, %p985_p7  ;;  %p801_p13 = por %p800_p12, %p799_p10 }
  0x35   : > { %406 = vmatpush.msra.mxu0 %v366_v14  ;;  %v414_v50 = vld [vmem:[#allocation8 + $0x8] sm:$0xff]  ;;  %v413_v51 = vld [vmem:[#allocation8] sm:$0xff] }
  0x36   : > { %432 = vmatpush.msra.mxu1 %v426_v18  ;;  %v369_v52 = vld [vmem:[%s1065_s2] sm:$0x1]  ;;  %p797_p8 = pneg %p796_p4 }
  0x37   : > { %353 = vadd.xlane.f32.xlu0 %v352_v10  ;;  %407 = vmatpush.msra.mxu0 %v365_v15  ;;  %v429_v56 = vld [vmem:[%s1067_s4] sm:$0x1] }
  0x38   : > { %359 = vadd.xlane.f32.xlu1 %v358_v11  ;;  %433 = vmatpush.msra.mxu1 %v425_v19  ;;  %p802_p0 = pnand %p801_p13, %p797_p8 }
  0x3a   : > { %434 = vmatpush.msra.mxu1 %v424_v20 }
  0x3c   : > { %435 = vmatpush.msra.mxu1 %v423_v21 }
  0x3e   : > { %436 = vmatpush.msra.mxu1 %v422_v22 }
  0x40   : > { %437 = vmatpush.msra.mxu1 %v421_v23 }
  0x42   : > { %438 = vmatpush.msra.mxu1 %v420_v24 }
  0x44   : > { %439 = vmatpush.msra.mxu1 %v419_v27 }
  0x46   : > { %440 = vmatpush.msra.mxu1 %v418_v29 }
  0x48   : > { %441 = vmatpush.msra.mxu1 %v417_v31 }
  0x4a   : > { %442 = vmatpush.msra.mxu1 %v416_v32 }
  0x4c   : > { %443 = vmatpush.msra.mxu1 %v415_v49 }
  0x4e   : > { %444 = vmatpush.msra.mxu1 %v414_v50 }
  0x50   : > { %445 = vmatpush.msra.mxu1 %v413_v51 }
  0xa2   : > { %v351_v26 = vpop.xlane.xlu0 %350 }
  0xa3   : > { %v357_v28 = vpop.xlane.xlu1 %356  ;;  %v361_v33 = vmul.f32 0.00390625, %v351_v26 }
  0xa4   : > { %v363_v36 = vmul.f32 0.00390625, %v357_v28 }
  0xa5   : > { %v376_v42 = vperm.slane %v361_v33, %v375_v30 }
  0xa6   : > { %v382_v44 = vperm.slane %v363_v36, %v381_v35 }
  0xaa   : > { %v354_v37 = vpop.xlane.xlu0 %353 }
  0xab   : > { %v362_v39 = vmul.f32 0.00390625, %v354_v37  ;;  %v360_v40 = vpop.xlane.xlu1 %359 }
  0xac   : > { %v364_v41 = vmul.f32 0.00390625, %v360_v40 }
  0xad   : > { %v378_v43 = vperm.slane %v362_v39, %v377_v34 }
  0xae   : > { %v386_v45 = vperm.slane %v364_v41, %v385_v38 }
  0xaf   : > { %v380_v46 = vsel %vm379_vm0, %v378_v43, %v376_v42 }
  0xb0   : > { %v384_v47 = vsel %vm383_vm1, %v382_v44, %v380_v46 }
  0xb1   : > { %v388_v48 = vsel %vm387_vm2, %v386_v45, %v384_v47 }
  0xb2   : > { %592 = vmatmul.msk.f32.vlgmr.msra.gmra.mxu0 %vm389_vm3, %v388_v48 }
 0x12f   : > { %v409_v53 = vpop.f32.mrf.mxu0 }
 0x130   : > { %v410_v54 = vadd.f32 %v409_v53, %v369_v52 }
 0x132   : > { %v412_v55 = vmax.f32 %v410_v54, 0.0 }
 0x134   : > { %446 = vmatmul.f32.vlgmr.msra.gmra.mxu1 %v412_v55 }
 0x1b1   : > { %v447_v57 = vpop.f32.mrf.mxu1 }
 0x1b2   : > { %v448_v58 = vadd.f32 %v447_v57, %v429_v56 }
 0x1b4   : > { %v593_v59 = vmul.f32 -1.442695, %v448_v58 }
 0x1b6   : > { %684 = vpow2.f32 %v593_v59 }
 0x1bc   : > { %v685_v60 = vpop.eup %684 }
 0x1bd   : > { %v453_v61 = vadd.f32 1.0, %v685_v60 }
 0x1bf   : > { %686 = vrcp.f32 %v453_v61  ;;  %v465_v1 = vand.u32 2147483648, %v453_v61  ;;  %v463_v3 = vand.u32 2147483647, %v453_v61  ;;  %vm459_vm5 = vweird.f32 %v453_v61 }
 0x1c1   : > { %v466_v5 = vor.u32 1.1754944e-38, %v465_v1  ;;  %vm464_vm7 = vcmp.eq.f32.partialorder %v463_v3, 8.507059e+37 }
 0x1c5   : > { %v687_v62 = vpop.eup %686 }
 0x1c6   : > { %v455_v63 = vmul.f32 %v687_v62, %v453_v61  ;;  %vm460_vm4 = vweird.f32 %v687_v62 }
 0x1c7   : > { %vm461_vm6 = vmor %vm459_vm5, %vm460_vm4 }
 0x1c8   : > { %v456_v0 = vsub.f32 1.0, %v455_v63 }
 0x1ca   : > { %v457_v2 = vmul.f32 %v687_v62, %v456_v0 }
 0x1cc   : > { %v458_v4 = vadd.f32 %v687_v62, %v457_v2 }
 0x1ce   : > { %v462_v6 = vsel %vm461_vm6, %v687_v62, %v458_v4 }
 0x1cf   : > { %v467_v7 = vsel %vm464_vm7, %v466_v5, %v462_v6 }
 0x1d0   : > { %469 = vst [vmem:[%s292_s9] sm:$0x1] %v467_v7 }
 0x1d1   : > { %805 = shalt.err (!%p802_p0)
}
 0x1d2   : > { %607 = dma.vmem_to_hbm [thread:$0]  (%p985_p7), %s482_s13, 16, %s484_s14, %s471_s21  }
 0x1d3 PF: > { %s495_s25 = sand.u32 1, %s844_s18   ;;  %p621_p3 = pnand %p584_p11, %p951_p6 }
 0x1d4   : > { %s496_s1 = scalar_lea.sflag [#allocation5], %s495_s25 }
 0x1d5   : > { %p622_p5 = pneg %p621_p3 }
 0x1d7   : > { %839 = dma.done.wait (%p622_p5), %s496_s1, 16  }
 0x1d8   : > { %841 = vsyncadd (%p622_p5), %s496_s1, 4294967280  ;;  %s22_s23 = sadd.s32 1, %s864_s23   ;;  %s1082_s6 = sld [smem:[#allocation13_spill]] }
 0x1d9   : > { %p19_p9 = scmp.ge.s32.totalorder %s22_s23, 4   ;;  %s1083_s18 = smov %s848_s19 }
 0x1da   : > { %s1084_s19 = smov %s852_s20  ;;  %s1085_s20 = smov %s994_s12 }
 0x1db   : > { %s1086_s21 = smov %s860_s22  ;;  %21 = sbr.rel (!%p19_p9) target bundleno = 10 (0xa), region = 101 }
 0x1de   : > { %s1087_s22 = smov %s1082_s6 }
 0x1e0   :  { %501 = vsyncpa [#allocation4], 1 }
 0x1e1   :  { %503 = vsyncpa [#allocation4 + $0x1], 1 }
 0x1e2   :  { %504 = vsyncpa [#allocation7], 1 }
 0x1e3   :  { %505 = vsyncpa [#allocation5], 1 }
 0x1e4   :  { %507 = vsyncpa [#allocation5 + $0x1], 1 }

</bundles_post_ra>
